<compile_context>
chip_gen: v7x
topology: tpu7x:2x2x1
jax: 0.10.0
libtpu: 0.0.40
codegen_flags: <defaults>
</compile_context>

<pallas_src>
import functools

import jax
import jax.numpy as jnp
from jax.experimental import pallas as pl
from jax.experimental.pallas import tpu as pltpu


def _round_up(x, m):
    return (x + m - 1) // m * m


def conv_max_kernel(xc_ref, wconv_ref, bconv_ref, wfc_ref, bfc_ref, out_ref,
                    *, t_len, batch_tile):
    # xc_ref:    (t_len * batch_tile, WDp)  bf16 im2col rows, time-major in block
    # wconv_ref: (WDp, Kp)  bf16 flattened, zero-padded conv weight
    # bconv_ref: (1, Kp)    f32 zero-padded conv bias
    # wfc_ref:   (Kp, Fp)   bf16 zero-padded FC weight
    # bfc_ref:   (1, Fp)    f32 zero-padded FC bias
    # out_ref:   (batch_tile, Fp) f32
    #
    # Conv1d over all taps and all (time, batch) rows as ONE MXU matmul;
    # bf16 operands, f32 accumulation.
    scores = jnp.dot(xc_ref[...], wconv_ref[...],
                     preferred_element_type=jnp.float32)       # (T*Bt, Kp) f32
    kp = scores.shape[-1]
    # Rows are time-major (row = t*Bt + b) and Bt % 8 == 0, so this reshape is
    # sublane-tile aligned; the max over time is a cheap cross-vreg VPU max.
    scores = scores.reshape(t_len, batch_tile, kp)
    mx = jnp.max(scores, axis=0)                               # (Bt, Kp) f32
    # Bias + ReLU after the max (exact: both are monotone in t).  Dropout is
    # identity in eval/inference mode.
    mx = jnp.maximum(mx + bconv_ref[...], 0.0)                 # (Bt, Kp) f32
    latent = jnp.dot(mx.astype(wfc_ref.dtype), wfc_ref[...],
                     preferred_element_type=jnp.float32) + bfc_ref[...]
    # Second dropout is also identity in eval mode.
    out_ref[...] = latent.astype(out_ref.dtype)


def _pick_batch_tile(batch, t_len, wdp, kp, fp, itemsize, budget_bytes):
    """Largest multiple-of-8 batch tile whose per-block VMEM footprint fits
    budget_bytes, without padding far beyond the real batch, and keeping
    >= 2 grid steps for batches that allow it (v7x megacore)."""
    per_row = (2 * t_len * wdp * itemsize     # double-buffered im2col stream
               + t_len * kp * 4               # f32 conv-score intermediate
               + 2 * fp * 4)                  # double-buffered f32 output
    fixed = (2 * (wdp * kp + kp * fp) * itemsize   # double-buffered weights
             + 2 * (kp + fp) * 4)                  # biases
    bt = (budget_bytes - fixed) // max(per_row, 1)
    bt = max(8, min(256, (bt // 8) * 8))
    bt = min(bt, _round_up(batch, 8))
    if batch > 8 and -(-batch // bt) < 2:
        bt = max(8, _round_up(-(-batch // 2), 8))
    return bt


def conv_max_layer(x, w_conv, b_conv, w_fc, b_fc, *, kernel_width,
                   batch_tile=None, compute_dtype=jnp.bfloat16,
                   vmem_limit_bytes=48 << 20):
    """x: (B, L, D). w_conv: (W, D, K). b_conv: (K,). w_fc: (K, F). b_fc: (F,).

    Returns (B, F) float32.  batch_tile (multiple of 8) is auto-sized against
    the VMEM budget when None.  vmem_limit_bytes=48 MiB raises the scoped limit
    past the v5e/v6e defaults while staying under v7x's 64 MiB physical VMEM.
    """
    B, L, D = x.shape
    W = kernel_width
    T = L - W + 1
    K = w_conv.shape[-1]
    F = w_fc.shape[-1]

    WD = W * D
    WDp = _round_up(WD, 128)   # lane-dense contraction dim
    Kp = _round_up(K, 128)     # lane-dense conv channels
    Fp = _round_up(F, 128)     # lane-dense output / unmasked stores

    itemsize = jnp.dtype(compute_dtype).itemsize
    if batch_tile is None:
        batch_tile = _pick_batch_tile(B, T, WDp, Kp, Fp, itemsize,
                                      budget_bytes=(vmem_limit_bytes * 4) // 5)
    assert batch_tile % 8 == 0, "batch_tile must be a multiple of 8"
    Bt = batch_tile
    nb = -(-B // Bt)           # number of batch blocks (grid size)
    Bp = nb * Bt

    # ---- wrapper-side layout plumbing (bf16, transpose BEFORE im2col) ------
    x_c = jnp.pad(x.astype(compute_dtype), ((0, Bp - B), (0, 0), (0, 0)))
    # Time-major order inside each batch block on the raw tensor.
    x_tm = x_c.reshape(nb, Bt, L, D).transpose(0, 2, 1, 3)       # (nb, L, Bt, D)
    # im2col: last-axis index w*D + d  <->  x[b, t + w, d]  (matches the
    # (W, D, K) -> (W*D, K) conv-weight flattening below).
    x_col = jnp.concatenate([x_tm[:, w:w + T] for w in range(W)], axis=-1)
    x_col = jnp.pad(x_col, ((0, 0), (0, 0), (0, 0), (0, WDp - WD)))
    x_col = x_col.reshape(nb * T * Bt, WDp)

    # Weights in bf16 (MXU-native); padded rows/cols are zero so results are
    # unchanged.  Biases stay f32 (tiny, added after f32 accumulation).
    w_conv_p = (jnp.zeros((WDp, Kp), compute_dtype)
                .at[:WD, :K].set(w_conv.reshape(WD, K).astype(compute_dtype)))
    b_conv_p = jnp.zeros((1, Kp), jnp.float32).at[0, :K].set(
        b_conv.astype(jnp.float32))
    w_fc_p = (jnp.zeros((Kp, Fp), compute_dtype)
              .at[:K, :F].set(w_fc.astype(compute_dtype)))
    b_fc_p = jnp.zeros((1, Fp), jnp.float32).at[0, :F].set(
        b_fc.astype(jnp.float32))

    kernel = functools.partial(conv_max_kernel, t_len=T, batch_tile=Bt)

    # x_col is the only grid-varying operand; deepen its pipeline only when
    # there are enough grid steps for extra buffering to hide DMA.
    xcol_kwargs = {"pipeline_mode": pl.Buffered(3)} if nb >= 3 else {}
    xcol_spec = pl.BlockSpec((T * Bt, WDp), lambda b: (b, 0), **xcol_kwargs)

    out = pl.pallas_call(
        kernel,
        out_shape=jax.ShapeDtypeStruct((Bp, Fp), jnp.float32),
        grid_spec=pltpu.PrefetchScalarGridSpec(
            num_scalar_prefetch=0,
            grid=(nb,),
            in_specs=[
                xcol_spec,                                        # im2col block
                pl.BlockSpec((WDp, Kp), lambda b: (0, 0)),        # conv weight
                pl.BlockSpec((1, Kp), lambda b: (0, 0)),          # conv bias
                pl.BlockSpec((Kp, Fp), lambda b: (0, 0)),         # fc weight
                pl.BlockSpec((1, Fp), lambda b: (0, 0)),          # fc bias
            ],
            out_specs=pl.BlockSpec((Bt, Fp), lambda b: (b, 0)),
        ),
        compiler_params=pltpu.CompilerParams(
            dimension_semantics=("parallel",),
            vmem_limit_bytes=vmem_limit_bytes),
    )(x_col, w_conv_p, b_conv_p, w_fc_p, b_fc_p)

    return out[:B, :F]


def reference(x, w_conv, b_conv, w_fc, b_fc, kernel_width):
    """Pure-JAX f32 reference mirroring the PyTorch forward (eval mode)."""
    B, L, D = x.shape
    T = L - kernel_width + 1
    out = 0.0
    for w in range(kernel_width):
        out = out + jnp.einsum("btd,dk->btk", x[:, w:w + T, :], w_conv[w],
                               precision="highest")
    out = jax.nn.relu(out + b_conv[None, None, :])
    mx = jnp.max(out, axis=1)                    # (B, K)
    return jnp.dot(mx, w_fc, precision="highest") + b_fc[None, :]


if __name__ == "__main__":
    # Config (DeepConnConfig defaults + small word_dim / review_length)
    kernel_width = 3      # W
    kernel_num = 100      # K
    latent_factors = 32   # F
    word_dim = 32         # D
    review_length = 16    # L
    batch = 2             # B

    key = jax.random.PRNGKey(0)
    k_x, k_wc, k_bc, k_wf, k_bf = jax.random.split(key, 5)

    x = jax.random.normal(k_x, (batch, review_length, word_dim), jnp.float32)

    # Conv1d weight in PyTorch: (out_channels=K, in_channels=D, W).
    # Stored transposed as (W, D, K) so flattening gives a (W*D, K) matrix.
    w_conv = 0.1 * jax.random.normal(k_wc, (kernel_width, word_dim, kernel_num),
                                     jnp.float32)
    b_conv = 0.1 * jax.random.normal(k_bc, (kernel_num,), jnp.float32)

    # Linear weight in PyTorch: (F, K); stored transposed as (K, F).
    w_fc = 0.1 * jax.random.normal(k_wf, (kernel_num, latent_factors), jnp.float32)
    b_fc = 0.1 * jax.random.normal(k_bf, (latent_factors,), jnp.float32)

    out = conv_max_layer(x, w_conv, b_conv, w_fc, b_fc,
                         kernel_width=kernel_width)
    out = jax.block_until_ready(out)

    ref = reference(x, w_conv, b_conv, w_fc, b_fc, kernel_width)
    assert out.shape == (batch, latent_factors), out.shape
    # Tolerance covers bf16 operand storage (with f32 accumulation) vs the
    # full-precision f32 reference; values here are O(1).
    max_diff = float(jnp.max(jnp.abs(out - ref)))
    assert jnp.allclose(out, ref, atol=5e-2, rtol=5e-2), \
        f"max abs diff {max_diff}"

    print("KERNEL_OK")
</pallas_src>

<mosaic_0001>
module attributes {stable_mosaic.version = 11 : i64} {
  func.func @conv_max_kernel(%arg0: i32, %arg1: memref<112x128xbf16, #tpu.memory_space<vmem>>, %arg2: memref<128x128xbf16, #tpu.memory_space<vmem>>, %arg3: memref<1x128xf32, #tpu.memory_space<vmem>>, %arg4: memref<128x128xbf16, #tpu.memory_space<vmem>>, %arg5: memref<1x128xf32, #tpu.memory_space<vmem>>, %arg6: memref<8x128xf32, #tpu.memory_space<vmem>>) attributes {dimension_semantics = [#tpu.dimension_semantics<parallel>], iteration_bounds = array<i64: 1>, scalar_prefetch = 0 : i64, scratch_operands = 0 : i64, tpu.core_type = #tpu.core_type<tc>, window_params = [{transform_indices = @transform_0, window_bounds = array<i64: 112, 128>}, {pipeline_mode = #tpu.pipeline_mode<synchronous>, transform_indices = @transform_1, window_bounds = array<i64: 128, 128>}, {pipeline_mode = #tpu.pipeline_mode<synchronous>, transform_indices = @transform_2, window_bounds = array<i64: 1, 128>}, {pipeline_mode = #tpu.pipeline_mode<synchronous>, transform_indices = @transform_3, window_bounds = array<i64: 128, 128>}, {pipeline_mode = #tpu.pipeline_mode<synchronous>, transform_indices = @transform_4, window_bounds = array<i64: 1, 128>}, {transform_indices = @transform_5, window_bounds = array<i64: 8, 128>}]} {
    %c0 = arith.constant 0 : index
    %c0_0 = arith.constant 0 : index
    %0 = vector.load %arg1[%c0, %c0_0] : memref<112x128xbf16, #tpu.memory_space<vmem>>, vector<112x128xbf16>
    %c0_1 = arith.constant 0 : index
    %c0_2 = arith.constant 0 : index
    %1 = vector.load %arg2[%c0_1, %c0_2] : memref<128x128xbf16, #tpu.memory_space<vmem>>, vector<128x128xbf16>
    %cst = arith.constant dense<0.000000e+00> : vector<112x128xf32>
    %2 = tpu.matmul %0, %1, %cst {dimension_numbers = #tpu.dot_dimension_numbers<[1], [0], [0], [1], [0, 0, 1, 1], [], []>} : vector<112x128xbf16>, vector<128x128xbf16>, vector<112x128xf32> -> vector<112x128xf32>
    %3 = vector.shape_cast %2 : vector<112x128xf32> to vector<14x8x128xf32>
    %cst_3 = arith.constant dense<0xFF800000> : vector<8x128xf32>
    %4 = vector.multi_reduction <maximumf>, %3, %cst_3 [0] : vector<14x8x128xf32> to vector<8x128xf32>
    %c0_4 = arith.constant 0 : index
    %c0_5 = arith.constant 0 : index
    %5 = vector.load %arg3[%c0_4, %c0_5] : memref<1x128xf32, #tpu.memory_space<vmem>>, vector<1x128xf32>
    %6 = vector.broadcast %5 : vector<1x128xf32> to vector<8x128xf32>
    %7 = arith.addf %4, %6 : vector<8x128xf32>
    %cst_6 = arith.constant 0.000000e+00 : f32
    %8 = vector.broadcast %cst_6 : f32 to vector<8x128xf32>
    %9 = arith.maximumf %7, %8 : vector<8x128xf32>
    %10 = arith.truncf %9 : vector<8x128xf32> to vector<8x128xbf16>
    %c0_7 = arith.constant 0 : index
    %c0_8 = arith.constant 0 : index
    %11 = vector.load %arg4[%c0_7, %c0_8] : memref<128x128xbf16, #tpu.memory_space<vmem>>, vector<128x128xbf16>
    %cst_9 = arith.constant dense<0.000000e+00> : vector<8x128xf32>
    %12 = tpu.matmul %10, %11, %cst_9 {dimension_numbers = #tpu.dot_dimension_numbers<[1], [0], [0], [1], [0, 0, 1, 1], [], []>} : vector<8x128xbf16>, vector<128x128xbf16>, vector<8x128xf32> -> vector<8x128xf32>
    %c0_10 = arith.constant 0 : index
    %c0_11 = arith.constant 0 : index
    %13 = vector.load %arg5[%c0_10, %c0_11] : memref<1x128xf32, #tpu.memory_space<vmem>>, vector<1x128xf32>
    %14 = vector.broadcast %13 : vector<1x128xf32> to vector<8x128xf32>
    %15 = arith.addf %12, %14 : vector<8x128xf32>
    %c0_12 = arith.constant 0 : index
    %c0_13 = arith.constant 0 : index
    %16 = vector.load %arg6[%c0_12, %c0_13] : memref<8x128xf32, #tpu.memory_space<vmem>>, vector<8x128xf32>
    tpu.vector_store %arg6[%c0_12, %c0_13], %15 {strides = array<i32>} : memref<8x128xf32, #tpu.memory_space<vmem>>, vector<8x128xf32>,
    return
  }
  func.func @transform_0(%arg0: i32) -> (i32, i32) {
    %c0_i32 = arith.constant 0 : i32
    %c0_i32_0 = arith.constant 0 : i32
    return %arg0, %c0_i32 : i32, i32
  }
  func.func @transform_1(%arg0: i32) -> (i32, i32) {
    %c0_i32 = arith.constant 0 : i32
    %c0_i32_0 = arith.constant 0 : i32
    %c0_i32_1 = arith.constant 0 : i32
    return %c0_i32, %c0_i32_0 : i32, i32
  }
  func.func @transform_2(%arg0: i32) -> (i32, i32) {
    %c0_i32 = arith.constant 0 : i32
    %c0_i32_0 = arith.constant 0 : i32
    %c0_i32_1 = arith.constant 0 : i32
    return %c0_i32, %c0_i32_0 : i32, i32
  }
  func.func @transform_3(%arg0: i32) -> (i32, i32) {
    %c0_i32 = arith.constant 0 : i32
    %c0_i32_0 = arith.constant 0 : i32
    %c0_i32_1 = arith.constant 0 : i32
    return %c0_i32, %c0_i32_0 : i32, i32
  }
  func.func @transform_4(%arg0: i32) -> (i32, i32) {
    %c0_i32 = arith.constant 0 : i32
    %c0_i32_0 = arith.constant 0 : i32
    %c0_i32_1 = arith.constant 0 : i32
    return %c0_i32, %c0_i32_0 : i32, i32
  }
  func.func @transform_5(%arg0: i32) -> (i32, i32) {
    %c0_i32 = arith.constant 0 : i32
    %c0_i32_0 = arith.constant 0 : i32
    return %arg0, %c0_i32 : i32, i32
  }
}

</mosaic_0001>

<bundles_post_ra>
// kernel: tpu_custom_call.1
= control target key start
LH: loop header
LB: loop body
LE: loop exit
PB: predicated region body
PF: predicated region fallthrough
CT: control target
= control target key end

     0   :  { %10 = vsyncpa [#allocation3], 0  ;;  %s801_s0 = inlined_call_operand.hbm [shape: bf16[112,128], index: 0, kind: input, shape index: {}]   ;;  %s802_s1 = inlined_call_operand.hbm [shape: bf16[128,128], index: 1, kind: input, shape index: {}]   ;;  %s803_s2 = inlined_call_operand.vmem [shape: f32[1,128], index: 2, kind: input, shape index: {}]   ;;  %s804_s3 = inlined_call_operand.hbm [shape: bf16[128,128], index: 3, kind: input, shape index: {}]   ;;  %s805_s4 = inlined_call_operand.vmem [shape: f32[1,128], index: 4, kind: input, shape index: {}]   ;;  %s806_s5 = inlined_call_operand.hbm [shape: f32[8,128], index: 5, kind: output, shape index: {}]  }
   0x1   :  { %11 = vsyncpa [#allocation6], 0 }
   0x2   :  { %12 = vsyncpa [#allocation4], 0  ;;  %s661_s18 = smov [#allocation5]   ;;  %s662_s20 = smov [#allocation2]  }
   0x3   :  { %s30_s19 = sshll.u32 %s661_s18, 4  ;;  %s18_s21 = sshll.u32 %s662_s20, 4  ;;  %s31_s19 = int_to_ptr.vmem [resolvable:$true] %s30_s19  ;;  %s699_s21 = int_to_ptr.vmem [resolvable:$true] %s18_s21 }
   0x4   :  { %s567_s24 = scalar_lea.hbm %s802_s1, 1024 }
   0x5   :  { %p568_p0 = scmp.ne.s32.totalorder %s802_s1, %s567_s24  ;;  %p571_p1 = scmp.lt.u32.totalorder %s567_s24, %s802_s1 }
   0x7   :  { %p573_p2 = pnand %p571_p1, %p568_p0 }
   0x9   :  { %576 = shalt.err (!%p573_p2)
}
   0xa   :  { %s577_s29 = scalar_lea.vmem %s31_s19, 1024  ;;  %p582_p4 = scmp.lt.s32.totalorder %s31_s19, %s31_s19 }
   0xb   :  { %p578_p3 = scmp.ne.s32.totalorder %s31_s19, %s577_s29  ;;  %p583_p5 = scmp.lt.s32.totalorder %s577_s29, %s577_s29 }
   0xd   :  { %p584_p6 = por %p583_p5, %p582_p4 }
   0xf   :  { %p585_p7 = pnand %p584_p6, %p578_p3 }
  0x11   :  { %588 = shalt.err (!%p585_p7)
}
  0x12   :  { %s663_s30 = smov 64   ;;  %s664_s6 = smov 4  }
  0x13   :  { %36 = dma.hbm_to_vmem [thread:$0]  %s802_s1, 1024, %s31_s19, [#allocation6], %s663_s30, %s663_s30, %s664_s6  }
  0x14   :  { %s589_s11 = scalar_lea.hbm %s801_s0, 896 }
  0x15   :  { %p590_p8 = scmp.ne.s32.totalorder %s801_s0, %s589_s11  ;;  %p593_p9 = scmp.lt.u32.totalorder %s589_s11, %s801_s0 }
  0x17   :  { %p595_p10 = pnand %p593_p9, %p590_p8 }
  0x19   :  { %598 = shalt.err (!%p595_p10)
}
  0x1a   :  { %s599_s16 = scalar_lea.vmem %s699_s21, 896  ;;  %p604_p12 = scmp.lt.s32.totalorder %s699_s21, %s699_s21 }
  0x1b   :  { %p600_p11 = scmp.ne.s32.totalorder %s699_s21, %s599_s16  ;;  %p605_p13 = scmp.lt.s32.totalorder %s599_s16, %s599_s16 }
  0x1d   :  { %p606_p0 = por %p605_p13, %p604_p12 }
  0x1f   :  { %p607_p1 = pnand %p606_p0, %p600_p11 }
  0x21   :  { %610 = shalt.err (!%p607_p1)
}
  0x22   :  { %24 = dma.hbm_to_vmem [thread:$0]  %s801_s0, 896, %s699_s21, [#allocation3], %s663_s30, %s663_s30, %s664_s6  }
  0x23   :  { %s665_s18 = smov [#allocation7]   ;;  %s611_s23 = scalar_lea.hbm %s804_s3, 1024 }
  0x24   :  { %s44_s19 = sshll.u32 %s665_s18, 4  ;;  %p612_p2 = scmp.ne.s32.totalorder %s804_s3, %s611_s23  ;;  %s45_s19 = int_to_ptr.vmem [resolvable:$true] %s44_s19 }
  0x25   :  { %p615_p3 = scmp.lt.u32.totalorder %s611_s23, %s804_s3 }
  0x27   :  { %p617_p4 = pnand %p615_p3, %p612_p2 }
  0x29   :  { %620 = shalt.err (!%p617_p4)
}
  0x2a   :  { %s621_s28 = scalar_lea.vmem %s45_s19, 1024  ;;  %p626_p6 = scmp.lt.s32.totalorder %s45_s19, %s45_s19 }
  0x2b   :  { %p622_p5 = scmp.ne.s32.totalorder %s45_s19, %s621_s28  ;;  %p627_p7 = scmp.lt.s32.totalorder %s621_s28, %s621_s28 }
  0x2d   :  { %p628_p8 = por %p627_p7, %p626_p6 }
  0x2f   :  { %p629_p9 = pnand %p628_p8, %p622_p5 }
  0x31   :  { %632 = shalt.err (!%p629_p9)
}
  0x32   :  { %50 = dma.hbm_to_vmem [thread:$0]  %s804_s3, 1024, %s45_s19, [#allocation6], %s663_s30, %s663_s30, %s664_s6  }
  0x33   :  { %655 = dma.done.wait [#allocation3], 896  }
  0x34   :  { %656 = vsyncadd [#allocation3], 4294966400 }
  0x35   :  { %657 = dma.done.wait [#allocation6], 2048  }
  0x36   :  { %658 = vsyncadd [#allocation6], 4294965248  ;;  %v666_v0 = vmov 0.0   ;;  %vm667_vm0 = vmmov 0   ;;  %v544_v1 = vld [vmem:[#allocation5] sm:$0xff]   ;;  %v545_v2 = vld [vmem:[#allocation5 + $0x8] sm:$0xff]  }
  0x37   :  { %472 = vmatprep.subr.bf16.mxu0 %v666_v0  ;;  %488 = vmatprep.mubr.msk.bf16.mxu0 %vm667_vm0, %v666_v0  ;;  %v546_v3 = vld [vmem:[#allocation5 + $0x10] sm:$0xff]   ;;  %v547_v4 = vld [vmem:[#allocation5 + $0x18] sm:$0xff]   ;;  %v548_v5 = vld [vmem:[#allocation5 + $0x20] sm:$0xff]   ;;  %s668_s7 = smov [#allocation8]  }
  0x38   :  { %516 = vmatprep.subr.bf16.mxu1 %v666_v0  ;;  %532 = vmatprep.mubr.msk.bf16.mxu1 %vm667_vm0, %v666_v0  ;;  %v549_v6 = vld [vmem:[#allocation5 + $0x28] sm:$0xff]   ;;  %v550_v7 = vld [vmem:[#allocation5 + $0x30] sm:$0xff]   ;;  %v551_v8 = vld [vmem:[#allocation5 + $0x38] sm:$0xff]   ;;  %s413_s8 = sshll.u32 %s668_s7, 4  ;;  %s414_s8 = int_to_ptr.vmem [resolvable:$true] %s413_s8 }
  0x39   :  { %473 = vmatpush3.bf16.msra.mxu0 %v544_v1  ;;  %v552_v9 = vld [vmem:[#allocation2] sm:$0xff]   ;;  %v553_v10 = vld [vmem:[#allocation2 + $0x8] sm:$0xff]   ;;  %v554_v11 = vld [vmem:[#allocation2 + $0x10] sm:$0xff]   ;;  %s633_s9 = scalar_lea.vmem %s414_s8, 128  ;;  %p638_p11 = scmp.lt.s32.totalorder %s414_s8, %s414_s8 }
  0x3a   :  { %474 = vmatprep.subr.bf16.mxu0 %v666_v0  ;;  %v555_v12 = vld [vmem:[#allocation2 + $0x18] sm:$0xff]   ;;  %v556_v13 = vld [vmem:[#allocation2 + $0x20] sm:$0xff]   ;;  %v557_v14 = vld [vmem:[#allocation2 + $0x28] sm:$0xff]   ;;  %p634_p10 = scmp.ne.s32.totalorder %s414_s8, %s633_s9  ;;  %p639_p12 = scmp.lt.s32.totalorder %s633_s9, %s633_s9 }
  0x3b   :  { %v558_v15 = vld [vmem:[#allocation2 + $0x30] sm:$0xff]   ;;  %v559_v16 = vld [vmem:[#allocation7] sm:$0xff]   ;;  %v560_v17 = vld [vmem:[#allocation7 + $0x8] sm:$0xff]  }
  0x3c   :  { %517 = vmatpush3.bf16.msra.mxu1 %v559_v16  ;;  %v561_v18 = vld [vmem:[#allocation7 + $0x10] sm:$0xff]   ;;  %v562_v19 = vld [vmem:[#allocation7 + $0x18] sm:$0xff]   ;;  %v563_v20 = vld [vmem:[#allocation7 + $0x20] sm:$0xff]   ;;  %p640_p13 = por %p639_p12, %p638_p11 }
  0x3d   :  { %475 = vmatpush3.bf16.msra.mxu0 %v545_v2  ;;  %518 = vmatprep.subr.bf16.mxu1 %v666_v0  ;;  %v564_v21 = vld [vmem:[#allocation7 + $0x28] sm:$0xff]   ;;  %v565_v22 = vld [vmem:[#allocation7 + $0x30] sm:$0xff]   ;;  %v566_v23 = vld [vmem:[#allocation7 + $0x38] sm:$0xff]  }
  0x3e   :  { %476 = vmatprep.subr.bf16.mxu0 %v666_v0  ;;  %p641_p0 = pnand %p640_p13, %p634_p10 }
  0x40   :  { %519 = vmatpush3.bf16.msra.mxu1 %v560_v17 }
  0x41   :  { %477 = vmatpush3.bf16.msra.mxu0 %v546_v3  ;;  %520 = vmatprep.subr.bf16.mxu1 %v666_v0 }
  0x42   :  { %478 = vmatprep.subr.bf16.mxu0 %v666_v0 }
  0x44   :  { %521 = vmatpush3.bf16.msra.mxu1 %v561_v18 }
  0x45   :  { %479 = vmatpush3.bf16.msra.mxu0 %v547_v4  ;;  %522 = vmatprep.subr.bf16.mxu1 %v666_v0 }
  0x46   :  { %480 = vmatprep.subr.bf16.mxu0 %v666_v0 }
  0x48   :  { %523 = vmatpush3.bf16.msra.mxu1 %v562_v19 }
  0x49   :  { %481 = vmatpush3.bf16.msra.mxu0 %v548_v5  ;;  %524 = vmatprep.subr.bf16.mxu1 %v666_v0  ;;  %v439_v5 = vld [vmem:[%s805_s4] ss:$0 sm:$0xff] }
  0x4a   :  { %482 = vmatprep.subr.bf16.mxu0 %v666_v0 }
  0x4c   :  { %525 = vmatpush3.bf16.msra.mxu1 %v563_v20 }
  0x4d   :  { %483 = vmatpush3.bf16.msra.mxu0 %v549_v6  ;;  %526 = vmatprep.subr.bf16.mxu1 %v666_v0 }
  0x4e   :  { %484 = vmatprep.subr.bf16.mxu0 %v666_v0 }
  0x50   :  { %527 = vmatpush3.bf16.msra.mxu1 %v564_v21 }
  0x51   :  { %485 = vmatpush3.bf16.msra.mxu0 %v550_v7  ;;  %528 = vmatprep.subr.bf16.mxu1 %v666_v0 }
  0x52   :  { %486 = vmatprep.subr.bf16.mxu0 %v666_v0 }
  0x54   :  { %529 = vmatpush3.bf16.msra.mxu1 %v565_v22 }
  0x55   :  { %487 = vmatpush3.bf16.msra.mxu0 %v551_v8  ;;  %530 = vmatprep.subr.bf16.mxu1 %v666_v0 }
  0x58   :  { %489 = vmatmul.mubr.bf16.vlgmr.msra.gmra.mrb[0].mxu0 %v552_v9  ;;  %531 = vmatpush3.bf16.msra.mxu1 %v566_v23 }
  0x59   :  { %492 = vmatprep.mubr.msk.bf16.mxu0 %vm667_vm0, %v666_v0 }
  0x60   :  { %493 = vmatmul.mubr.bf16.gmra.mrb[4].mxu0 %v553_v10 }
  0x61   :  { %496 = vmatprep.mubr.msk.bf16.mxu0 %vm667_vm0, %v666_v0 }
  0x68   :  { %497 = vmatmul.mubr.bf16.gmra.mrb[8].mxu0 %v554_v11 }
  0x69   :  { %500 = vmatprep.mubr.msk.bf16.mxu0 %vm667_vm0, %v666_v0 }
  0x70   :  { %501 = vmatmul.mubr.bf16.gmra.mrb[12].mxu0 %v555_v12 }
  0x71   :  { %504 = vmatprep.mubr.msk.bf16.mxu0 %vm667_vm0, %v666_v0 }
  0x78   :  { %505 = vmatmul.mubr.bf16.gmra.mrb[16].mxu0 %v556_v13 }
  0x79   :  { %508 = vmatprep.mubr.msk.bf16.mxu0 %vm667_vm0, %v666_v0 }
  0x80   :  { %509 = vmatmul.mubr.bf16.gmra.mrb[20].mxu0 %v557_v14 }
  0x81   :  { %512 = vmatprep.mubr.msk.bf16.mxu0 %vm667_vm0, %v666_v0  ;;  %v438_v0 = vld [vmem:[%s803_s2] ss:$0 sm:$0xff] }
  0x88   :  { %513 = vmatmul.mubr.bf16.gmra.mrb[24].mxu0 %v558_v15 }
 0x12b   :  { %v217_v24 = vpop.f32.mrb[0].mxu0 }
 0x12c   :  { %v490_v25 = vpop.f32.mrb[1].mxu0 }
 0x12d   :  { %v220_v26 = vpop.f32.mrb[2].mxu0 }
 0x12e   :  { %v491_v27 = vpop.f32.mrb[3].mxu0 }
 0x133   :  { %v225_v28 = vpop.f32.mrb[4].mxu0 }
 0x134   :  { %v494_v29 = vpop.f32.mrb[5].mxu0 }
 0x135   :  { %v228_v30 = vpop.f32.mrb[6].mxu0 }
 0x136   :  { %v495_v31 = vpop.f32.mrb[7].mxu0 }
 0x13b   :  { %v233_v32 = vpop.f32.mrb[8].mxu0 }
 0x13c   :  { %v272_v33 = vmax.f32 %v217_v24, %v233_v32  ;;  %v498_v34 = vpop.f32.mrb[9].mxu0 }
 0x13d   :  { %v236_v35 = vpop.f32.mrb[10].mxu0 }
 0x13e   :  { %v273_v36 = vmax.f32 %v220_v26, %v236_v35  ;;  %v499_v37 = vpop.f32.mrb[11].mxu0 }
 0x143   :  { %v241_v38 = vpop.f32.mrb[12].mxu0 }
 0x144   :  { %v274_v39 = vmax.f32 %v225_v28, %v241_v38  ;;  %v502_v40 = vpop.f32.mrb[13].mxu0 }
 0x145   :  { %v244_v41 = vpop.f32.mrb[14].mxu0 }
 0x146   :  { %v275_v42 = vmax.f32 %v228_v30, %v244_v41  ;;  %v503_v43 = vpop.f32.mrb[15].mxu0 }
 0x14b   :  { %v249_v44 = vpop.f32.mrb[16].mxu0 }
 0x14c   :  { %v276_v45 = vmax.f32 %v272_v33, %v249_v44  ;;  %v506_v46 = vpop.f32.mrb[17].mxu0 }
 0x14d   :  { %v252_v47 = vpop.f32.mrb[18].mxu0 }
 0x14e   :  { %v277_v48 = vmax.f32 %v273_v36, %v252_v47  ;;  %v507_v49 = vpop.f32.mrb[19].mxu0 }
 0x153   :  { %v257_v50 = vpop.f32.mrb[20].mxu0 }
 0x154   :  { %v278_v51 = vmax.f32 %v274_v39, %v257_v50  ;;  %v510_v52 = vpop.f32.mrb[21].mxu0 }
 0x155   :  { %v260_v53 = vpop.f32.mrb[22].mxu0 }
 0x156   :  { %v279_v54 = vmax.f32 %v275_v42, %v260_v53  ;;  %v511_v55 = vpop.f32.mrb[23].mxu0 }
 0x158   :  { %v283_v56 = vmax.f32 %v278_v51, %v279_v54 }
 0x15b   :  { %v265_v57 = vpop.f32.mrb[24].mxu0 }
 0x15c   :  { %v280_v58 = vmax.f32 %v276_v45, %v265_v57  ;;  %v514_v59 = vpop.f32.mrb[25].mxu0 }
 0x15d   :  { %v268_v60 = vpop.f32.mrb[26].mxu0 }
 0x15e   :  { %v281_v61 = vmax.f32 %v277_v48, %v268_v60  ;;  %v515_v62 = vpop.f32.mrb[27].mxu0 }
 0x160   :  { %v282_v63 = vmax.f32 %v280_v58, %v281_v61 }
 0x162   :  { %v284_v1 = vmax.f32 %v282_v63, %v283_v56 }
 0x164   :  { %v292_v2 = vadd.f32 %v438_v0, %v284_v1 }
 0x166   :  { %v293_v3 = vmax.f32 %v292_v2, 0.0 }
 0x168   :  { %v294_v4 = vpack.c.bf16 %v293_v3, %v293_v3 }
 0x16a   :  { %533 = vmatmul.mubr.bf16.vlgmr.msra.gmra.mrb[0].mxu1 %v294_v4 }
 0x23d   :  { %v400_v6 = vpop.f32.mrb[0].mxu1 }
 0x23e   :  { %v401_v7 = vadd.f32 %v439_v5, %v400_v6  ;;  %v534_v8 = vpop.f32.mrb[1].mxu1 }
 0x23f   :  { %v403_v9 = vpop.f32.mrb[2].mxu1 }
 0x240   :  { %406 = vst [vmem:[#allocation8] sm:$0xff] %v401_v7  ;;  %v535_v10 = vpop.f32.mrb[3].mxu1 }
 0x241   :  { %644 = shalt.err (!%p641_p0)
}
 0x242   :  { %s645_s4 = scalar_lea.hbm %s806_s5, 128 }
 0x243   :  { %p646_p1 = scmp.ne.s32.totalorder %s806_s5, %s645_s4  ;;  %p649_p2 = scmp.lt.u32.totalorder %s645_s4, %s806_s5 }
 0x245   :  { %p651_p3 = pnand %p649_p2, %p646_p1 }
 0x247   :  { %654 = shalt.err (!%p651_p3)
}
 0x248   :  { %416 = dma.vmem_to_hbm [thread:$0]  %s414_s8, 128, %s806_s5, [#allocation4]  }
 0x249   :  { %659 = dma.done.wait [#allocation4], 128  }
 0x24a   :  { %660 = vsyncadd [#allocation4], 4294967168 }
 0x24b   :  { %420 = vsyncpa [#allocation3], 1 }
 0x24c   :  { %421 = vsyncpa [#allocation6], 1 }
 0x24d   :  { %422 = vsyncpa [#allocation4], 1 }

</bundles_post_ra>
